<compile_context>
chip_gen: v5e
topology: v5e:2x2
jax: 0.10.0
libtpu: 0.0.40
codegen_flags: <defaults>
</compile_context>

<pallas_src>
import functools

import jax
import jax.numpy as jnp
from jax.experimental import pallas as pl
from jax.experimental.pallas import tpu as pltpu

LANE = 128
SUBLANE = 8


def _round_up(n, m):
    return (n + m - 1) // m * m


def _pad_to(a, shape):
    pads = [(0, t - s) for s, t in zip(a.shape, shape)]
    if all(p == (0, 0) for p in pads):
        return a
    return jnp.pad(a, pads)


def mlp_kernel(x_ref, w1_ref, b1_ref, w2_ref, b2_ref, w3_ref, b3_ref, o_ref):
    # Cast the streamed f32 input tile to bf16 in-kernel (cheap VPU work,
    # avoids a separate wrapper pass and 4x the x DMA bytes).
    x = x_ref[...].astype(jnp.bfloat16)
    # fc1 + ReLU (bf16 MXU feed, f32 accumulate)
    h1 = jnp.dot(x, w1_ref[...], preferred_element_type=jnp.float32)
    h1 = jnp.maximum(h1 + b1_ref[...], 0.0).astype(jnp.bfloat16)
    # dropout (eval mode) == identity
    # fc2 + ReLU
    h2 = jnp.dot(h1, w2_ref[...], preferred_element_type=jnp.float32)
    h2 = jnp.maximum(h2 + b2_ref[...], 0.0).astype(jnp.bfloat16)
    # dropout (eval mode) == identity
    # fc3 (logits, no activation); lane-dense bf16 store
    out = jnp.dot(h2, w3_ref[...], preferred_element_type=jnp.float32)
    o_ref[...] = (out + b3_ref[...]).astype(o_ref.dtype)


def prepare_params(w1, b1, w2, b2, w3, b3):
    """One-time weight prep (hoisted out of the per-call hot path).

    Weights -> bf16, biases -> f32 row-vectors. Only the output feature dim is
    lane-padded to 128 (hidden dims stay at their true sizes: full-dim blocks
    are legal and unpadded h2=64 halves fc2/fc3 MXU passes).
    """
    out_dim = w3.shape[1]
    out_p = _round_up(out_dim, LANE)
    w1p = w1.astype(jnp.bfloat16)
    w2p = w2.astype(jnp.bfloat16)
    w3p = _pad_to(w3, (w3.shape[0], out_p)).astype(jnp.bfloat16)
    b1p = b1.reshape(1, -1).astype(jnp.float32)
    b2p = b2.reshape(1, -1).astype(jnp.float32)
    b3p = _pad_to(b3.reshape(1, -1), (1, out_p)).astype(jnp.float32)
    return (w1p, b1p, w2p, b2p, w3p, b3p), out_dim


@functools.partial(jax.jit, static_argnames=("out_dim", "block_rows"))
def _forward_padded(x, w1p, b1p, w2p, b2p, w3p, b3p, *, out_dim, block_rows=1024):
    batch, in_dim = x.shape
    h1_dim = w1p.shape[1]
    h2_dim = w2p.shape[1]
    out_p = w3p.shape[1]

    # Batch tile: sublane-aligned, <= block_rows, and capped at ~batch/2 so the
    # grid has >= 2 steps whenever the batch is big enough (gives v7x's second
    # TensorCore work via the "parallel" grid axis).
    tm = min(block_rows, _round_up(pl.cdiv(batch, 2), SUBLANE))
    batch_p = _round_up(batch, tm)
    grid = (batch_p // tm,)

    # Rows-only pad (no-op when batch is already a multiple of tm); x stays f32
    # and its feature dim stays unpadded.
    xp = _pad_to(x, (batch_p, in_dim))

    # Weights/biases: constant index_map -> same block every grid step ->
    # VMEM-resident across the whole batch loop.
    resident = lambda shape: pl.BlockSpec(shape, lambda i: (0, 0))

    flops = 2 * batch_p * (in_dim * h1_dim + h1_dim * h2_dim + h2_dim * out_p)
    bytes_accessed = (
        xp.size * 4                                   # f32 input, read once
        + (w1p.size + w2p.size + w3p.size) * 2        # bf16 weights
        + (b1p.size + b2p.size + b3p.size) * 4        # f32 biases
        + batch_p * out_p * 2                         # bf16 output
    )

    out_padded = pl.pallas_call(
        mlp_kernel,
        out_shape=jax.ShapeDtypeStruct((batch_p, out_p), jnp.bfloat16),
        grid=grid,
        in_specs=[
            # x: streamed over batch tiles (feature dim == full array dim).
            # TODO(synk): sweep pipeline_mode=pl.Buffered(3) here if profiling
            # shows the x DMA still exposed at large tm.
            pl.BlockSpec((tm, in_dim), lambda i: (i, 0)),
            resident((in_dim, h1_dim)),
            resident((1, h1_dim)),
            resident((h1_dim, h2_dim)),
            resident((1, h2_dim)),
            resident((h2_dim, out_p)),
            resident((1, out_p)),
        ],
        out_specs=pl.BlockSpec((tm, out_p), lambda i: (i, 0)),
        compiler_params=pltpu.CompilerParams(
            dimension_semantics=("parallel",),   # shard batch tiles across TCs
            vmem_limit_bytes=32 << 20,           # far above the ~3 MiB needed
        ),
        cost_estimate=pl.CostEstimate(
            flops=flops, transcendentals=0, bytes_accessed=bytes_accessed
        ),
    )(xp, w1p, b1p, w2p, b2p, w3p, b3p)

    # Slice real batch rows and the real output_dim columns back out (bf16).
    return out_padded[:batch, :out_dim]


def neural_network_forward(x, params, out_dim, block_rows=1024):
    """params = prepare_params(...)[0]; returns bf16 logits (batch, out_dim)."""
    w1p, b1p, w2p, b2p, w3p, b3p = params
    return _forward_padded(
        x, w1p, b1p, w2p, b2p, w3p, b3p, out_dim=out_dim, block_rows=block_rows
    )


def init_linear_params(key, in_features, out_features):
    """Deterministic init mimicking nn.Linear default U(-1/sqrt(in), 1/sqrt(in)).

    Returns W as [in_features, out_features] and b as [1, out_features].
    """
    kw, kb = jax.random.split(key)
    bound = 1.0 / jnp.sqrt(jnp.float32(in_features))
    w = jax.random.uniform(
        kw, (in_features, out_features), jnp.float32, minval=-bound, maxval=bound
    )
    b = jax.random.uniform(
        kb, (1, out_features), jnp.float32, minval=-bound, maxval=bound
    )
    return w, b


def reference_forward(x, w1, b1, w2, b2, w3, b3):
    h1 = jnp.maximum(x @ w1 + b1, 0.0)
    h2 = jnp.maximum(h1 @ w2 + b2, 0.0)
    return h2 @ w3 + b3


if __name__ == "__main__":
    # Small shapes consistent with the module: batch=8, input_dim=32,
    # hidden_dim=128 -> fc2 out = 64, output_dim=3.
    batch = 8
    input_dim = 32
    hidden_dim = 128
    output_dim = 3

    key = jax.random.PRNGKey(0)
    kx, k1, k2, k3 = jax.random.split(key, 4)

    x = jax.random.normal(kx, (batch, input_dim), jnp.float32)
    w1, b1 = init_linear_params(k1, input_dim, hidden_dim)
    w2, b2 = init_linear_params(k2, hidden_dim, hidden_dim // 2)
    w3, b3 = init_linear_params(k3, hidden_dim // 2, output_dim)

    # One-time weight prep (padding + dtype casts hoisted out of the hot path).
    params, out_dim = prepare_params(w1, b1, w2, b2, w3, b3)

    out = neural_network_forward(x, params, out_dim)
    out = jax.block_until_ready(out)

    ref = reference_forward(x, w1, b1, w2, b2, w3, b3)
    assert out.shape == (batch, output_dim)
    # Kernel uses bf16 weights/activations/output with f32 accumulation;
    # compare against the pure-f32 reference with a bf16-appropriate tolerance.
    assert jnp.allclose(out.astype(jnp.float32), ref, atol=5e-2, rtol=5e-2), (
        float(jnp.max(jnp.abs(out.astype(jnp.float32) - ref)))
    )

    # TODO(synk): training-mode dropout (p=0.5) would need pltpu.prng_seed /
    # pltpu.prng_random_bits inside the kernel; eval-mode (identity) is used here.
    print("KERNEL_OK")
</pallas_src>

<mosaic_0001>
module attributes {stable_mosaic.version = 11 : i64} {
  func.func @mlp_kernel(%arg0: i32, %arg1: memref<8x32xf32, #tpu.memory_space<vmem>>, %arg2: memref<32x128xbf16, #tpu.memory_space<vmem>>, %arg3: memref<1x128xf32, #tpu.memory_space<vmem>>, %arg4: memref<128x64xbf16, #tpu.memory_space<vmem>>, %arg5: memref<1x64xf32, #tpu.memory_space<vmem>>, %arg6: memref<64x128xbf16, #tpu.memory_space<vmem>>, %arg7: memref<1x128xf32, #tpu.memory_space<vmem>>, %arg8: memref<8x128xbf16, #tpu.memory_space<vmem>>) attributes {dimension_semantics = [#tpu.dimension_semantics<parallel>], iteration_bounds = array<i64: 1>, scalar_prefetch = 0 : i64, scratch_operands = 0 : i64, tpu.core_type = #tpu.core_type<tc>, window_params = [{transform_indices = @transform_0, window_bounds = array<i64: 8, 32>}, {pipeline_mode = #tpu.pipeline_mode<synchronous>, transform_indices = @transform_1, window_bounds = array<i64: 32, 128>}, {pipeline_mode = #tpu.pipeline_mode<synchronous>, transform_indices = @transform_2, window_bounds = array<i64: 1, 128>}, {pipeline_mode = #tpu.pipeline_mode<synchronous>, transform_indices = @transform_3, window_bounds = array<i64: 128, 64>}, {pipeline_mode = #tpu.pipeline_mode<synchronous>, transform_indices = @transform_4, window_bounds = array<i64: 1, 64>}, {pipeline_mode = #tpu.pipeline_mode<synchronous>, transform_indices = @transform_5, window_bounds = array<i64: 64, 128>}, {pipeline_mode = #tpu.pipeline_mode<synchronous>, transform_indices = @transform_6, window_bounds = array<i64: 1, 128>}, {transform_indices = @transform_7, window_bounds = array<i64: 8, 128>}]} {
    %c0 = arith.constant 0 : index
    %c0_0 = arith.constant 0 : index
    %0 = vector.load %arg1[%c0, %c0_0] : memref<8x32xf32, #tpu.memory_space<vmem>>, vector<8x32xf32>
    %1 = arith.truncf %0 : vector<8x32xf32> to vector<8x32xbf16>
    %c0_1 = arith.constant 0 : index
    %c0_2 = arith.constant 0 : index
    %2 = vector.load %arg2[%c0_1, %c0_2] : memref<32x128xbf16, #tpu.memory_space<vmem>>, vector<32x128xbf16>
    %cst = arith.constant dense<0.000000e+00> : vector<8x128xf32>
    %3 = tpu.matmul %1, %2, %cst {dimension_numbers = #tpu.dot_dimension_numbers<[1], [0], [0], [1], [0, 0, 1, 1], [], []>} : vector<8x32xbf16>, vector<32x128xbf16>, vector<8x128xf32> -> vector<8x128xf32>
    %c0_3 = arith.constant 0 : index
    %c0_4 = arith.constant 0 : index
    %4 = vector.load %arg3[%c0_3, %c0_4] : memref<1x128xf32, #tpu.memory_space<vmem>>, vector<1x128xf32>
    %5 = vector.broadcast %4 : vector<1x128xf32> to vector<8x128xf32>
    %6 = arith.addf %3, %5 : vector<8x128xf32>
    %cst_5 = arith.constant 0.000000e+00 : f32
    %7 = vector.broadcast %cst_5 : f32 to vector<8x128xf32>
    %8 = arith.maximumf %6, %7 : vector<8x128xf32>
    %9 = arith.truncf %8 : vector<8x128xf32> to vector<8x128xbf16>
    %c0_6 = arith.constant 0 : index
    %c0_7 = arith.constant 0 : index
    %10 = vector.load %arg4[%c0_6, %c0_7] : memref<128x64xbf16, #tpu.memory_space<vmem>>, vector<128x64xbf16>
    %cst_8 = arith.constant dense<0.000000e+00> : vector<8x64xf32>
    %11 = tpu.matmul %9, %10, %cst_8 {dimension_numbers = #tpu.dot_dimension_numbers<[1], [0], [0], [1], [0, 0, 1, 1], [], []>} : vector<8x128xbf16>, vector<128x64xbf16>, vector<8x64xf32> -> vector<8x64xf32>
    %c0_9 = arith.constant 0 : index
    %c0_10 = arith.constant 0 : index
    %12 = vector.load %arg5[%c0_9, %c0_10] : memref<1x64xf32, #tpu.memory_space<vmem>>, vector<1x64xf32>
    %13 = vector.broadcast %12 : vector<1x64xf32> to vector<8x64xf32>
    %14 = arith.addf %11, %13 : vector<8x64xf32>
    %cst_11 = arith.constant 0.000000e+00 : f32
    %15 = vector.broadcast %cst_11 : f32 to vector<8x64xf32>
    %16 = arith.maximumf %14, %15 : vector<8x64xf32>
    %17 = arith.truncf %16 : vector<8x64xf32> to vector<8x64xbf16>
    %c0_12 = arith.constant 0 : index
    %c0_13 = arith.constant 0 : index
    %18 = vector.load %arg6[%c0_12, %c0_13] : memref<64x128xbf16, #tpu.memory_space<vmem>>, vector<64x128xbf16>
    %cst_14 = arith.constant dense<0.000000e+00> : vector<8x128xf32>
    %19 = tpu.matmul %17, %18, %cst_14 {dimension_numbers = #tpu.dot_dimension_numbers<[1], [0], [0], [1], [0, 0, 1, 1], [], []>} : vector<8x64xbf16>, vector<64x128xbf16>, vector<8x128xf32> -> vector<8x128xf32>
    %c0_15 = arith.constant 0 : index
    %c0_16 = arith.constant 0 : index
    %20 = vector.load %arg7[%c0_15, %c0_16] : memref<1x128xf32, #tpu.memory_space<vmem>>, vector<1x128xf32>
    %21 = vector.broadcast %20 : vector<1x128xf32> to vector<8x128xf32>
    %22 = arith.addf %19, %21 : vector<8x128xf32>
    %23 = arith.truncf %22 : vector<8x128xf32> to vector<8x128xbf16>
    %c0_17 = arith.constant 0 : index
    %c0_18 = arith.constant 0 : index
    %24 = vector.load %arg8[%c0_17, %c0_18] : memref<8x128xbf16, #tpu.memory_space<vmem>>, vector<8x128xbf16>
    tpu.vector_store %arg8[%c0_17, %c0_18], %23 {strides = array<i32>} : memref<8x128xbf16, #tpu.memory_space<vmem>>, vector<8x128xbf16>,
    return
  }
  func.func @transform_0(%arg0: i32) -> (i32, i32) {
    %c0_i32 = arith.constant 0 : i32
    %c0_i32_0 = arith.constant 0 : i32
    return %arg0, %c0_i32 : i32, i32
  }
  func.func @transform_1(%arg0: i32) -> (i32, i32) {
    %c0_i32 = arith.constant 0 : i32
    %c0_i32_0 = arith.constant 0 : i32
    %c0_i32_1 = arith.constant 0 : i32
    return %c0_i32, %c0_i32_0 : i32, i32
  }
  func.func @transform_2(%arg0: i32) -> (i32, i32) {
    %c0_i32 = arith.constant 0 : i32
    %c0_i32_0 = arith.constant 0 : i32
    %c0_i32_1 = arith.constant 0 : i32
    return %c0_i32, %c0_i32_0 : i32, i32
  }
  func.func @transform_3(%arg0: i32) -> (i32, i32) {
    %c0_i32 = arith.constant 0 : i32
    %c0_i32_0 = arith.constant 0 : i32
    %c0_i32_1 = arith.constant 0 : i32
    return %c0_i32, %c0_i32_0 : i32, i32
  }
  func.func @transform_4(%arg0: i32) -> (i32, i32) {
    %c0_i32 = arith.constant 0 : i32
    %c0_i32_0 = arith.constant 0 : i32
    %c0_i32_1 = arith.constant 0 : i32
    return %c0_i32, %c0_i32_0 : i32, i32
  }
  func.func @transform_5(%arg0: i32) -> (i32, i32) {
    %c0_i32 = arith.constant 0 : i32
    %c0_i32_0 = arith.constant 0 : i32
    %c0_i32_1 = arith.constant 0 : i32
    return %c0_i32, %c0_i32_0 : i32, i32
  }
  func.func @transform_6(%arg0: i32) -> (i32, i32) {
    %c0_i32 = arith.constant 0 : i32
    %c0_i32_0 = arith.constant 0 : i32
    %c0_i32_1 = arith.constant 0 : i32
    return %c0_i32, %c0_i32_0 : i32, i32
  }
  func.func @transform_7(%arg0: i32) -> (i32, i32) {
    %c0_i32 = arith.constant 0 : i32
    %c0_i32_0 = arith.constant 0 : i32
    return %arg0, %c0_i32 : i32, i32
  }
}

</mosaic_0001>

<bundles_post_ra>
// kernel: _forward_padded.1
= control target key start
LH: loop header
LB: loop body
LE: loop exit
PB: predicated region body
PF: predicated region fallthrough
CT: control target
= control target key end

     0   :  { %vm49_vm0 = vcmask 261120   ;;  %vm187_vm1 = vcmask 523264   ;;  %s382_s1 = inlined_call_operand.vmem [shape: bf16[32,128], index: 1, kind: input, shape index: {}]   ;;  %s383_s0 = inlined_call_operand.vmem [shape: f32[8,32], index: 0, kind: input, shape index: {}]   ;;  %s384_s3 = inlined_call_operand.vmem [shape: bf16[128,64], index: 3, kind: input, shape index: {}]   ;;  %s385_s2 = inlined_call_operand.vmem [shape: f32[1,128], index: 2, kind: input, shape index: {}]   ;;  %s386_s4 = inlined_call_operand.vmem [shape: f32[1,64], index: 4, kind: input, shape index: {}]   ;;  %s387_s5 = inlined_call_operand.vmem [shape: bf16[64,128], index: 5, kind: input, shape index: {}]   ;;  %s388_s6 = inlined_call_operand.vmem [shape: f32[1,128], index: 6, kind: input, shape index: {}]   ;;  %s389_s7 = inlined_call_operand.vmem [shape: bf16[8,128], index: 7, kind: output, shape index: {}]  }
   0x1   :  { %v269_v0 = vld [vmem:[%s382_s1 + $0x8] sm:$0xff]  ;;  %v277_v1 = vld [vmem:[%s384_s3 + $0x38] sm:$0xff]  ;;  %v268_v2 = vld [vmem:[%s382_s1] sm:$0xff] }
   0x2   :  { %59 = vmatpush.bf16.msra.mxu0 %v269_v0  ;;  %v27_v3 = vld [vmem:[%s383_s0] sm:$0xff]  ;;  %136 = vmatpush.bf16.msra.mxu1 %v277_v1  ;;  %v276_v4 = vld [vmem:[%s384_s3 + $0x30] sm:$0xff]  ;;  %v275_v6 = vld [vmem:[%s384_s3 + $0x28] sm:$0xff] }
   0x3   :  { %v28_v5 = vpack.c.bf16 %v27_v3, %v27_v3  ;;  %v274_v7 = vld [vmem:[%s384_s3 + $0x20] sm:$0xff]  ;;  %v273_v8 = vld [vmem:[%s384_s3 + $0x18] sm:$0xff]  ;;  %v272_v9 = vld [vmem:[%s384_s3 + $0x10] sm:$0xff] }
   0x4   :  { %v271_v10 = vld [vmem:[%s384_s3 + $0x8] sm:$0xff]  ;;  %v270_v11 = vld [vmem:[%s384_s3] sm:$0xff]  ;;  %v281_v12 = vld [vmem:[%s387_s5 + $0x18] sm:$0xff] }
   0x5   :  { %195 = vmatpush.bf16.msra.mxu2 %v281_v12  ;;  %v280_v13 = vld [vmem:[%s387_s5 + $0x10] sm:$0xff]  ;;  %v282_v14 = vld [vmem:[%s385_s2] ss:$0 sm:$0xff]  ;;  %v279_v20 = vld [vmem:[%s387_s5 + $0x8] sm:$0xff] }
   0x6   :  { %60 = vmatpush.bf16.msra.mxu0 %v268_v2  ;;  %137 = vmatpush.bf16.msra.mxu1 %v276_v4  ;;  %v278_v21 = vld [vmem:[%s387_s5] sm:$0xff] }
   0x7   :  { %v283_v22 = vld [vmem:[%s386_s4] ss:$0 sm:$0xff] }
   0x8   :  { %v284_v28 = vld [vmem:[%s388_s6] ss:$0 sm:$0xff] }
   0x9   :  { %218 = vmatmul.msk.bf16.vlgmr.msra.gmra.mxu0 %vm49_vm0, %v28_v5  ;;  %196 = vmatpush.bf16.msra.mxu2 %v280_v13 }
   0xa   :  { %138 = vmatpush.bf16.msra.mxu1 %v275_v6 }
   0xd   :  { %197 = vmatpush.bf16.msra.mxu2 %v279_v20 }
   0xe   :  { %139 = vmatpush.bf16.msra.mxu1 %v274_v7 }
  0x11   :  { %198 = vmatpush.bf16.msra.mxu2 %v278_v21 }
  0x12   :  { %140 = vmatpush.bf16.msra.mxu1 %v273_v8 }
  0x16   :  { %141 = vmatpush.bf16.msra.mxu1 %v272_v9 }
  0x1a   :  { %142 = vmatpush.bf16.msra.mxu1 %v271_v10 }
  0x1e   :  { %143 = vmatpush.bf16.msra.mxu1 %v270_v11 }
  0x86   :  { %v62_v15 = vpop.f32.mrf.mxu0 }
  0x87   :  { %v63_v16 = vadd.f32 %v282_v14, %v62_v15 }
  0x89   :  { %v66_v17 = vmax.f32 %v63_v16, 0.0 }
  0x8b   :  { %v67_v18 = vpack.c.bf16 %v66_v17, %v66_v17 }
  0x8d   :  { %144 = vmatmul.bf16.vlgmr.msra.gmra.mxu1 %v67_v18 }
  0x8e   :  { %v64_v19 = vpop.f32.mrf.mxu0 }
 0x10a   :  { %v145_v23 = vpop.f32.mrf.mxu1 }
 0x10b   :  { %v146_v24 = vadd.f32 %v283_v22, %v145_v23 }
 0x10d   :  { %v149_v25 = vmax.f32 %v146_v24, 0.0 }
 0x10f   :  { %v150_v26 = vpack.c.bf16 %v149_v25, %v149_v25 }
 0x111   :  { %267 = vmatmul.msk.bf16.vlgmr.msra.gmra.mxu2 %vm187_vm1, %v150_v26 }
 0x112   :  { %v147_v27 = vpop.f32.mrf.mxu1 }
 0x194   :  { %v200_v29 = vpop.f32.mrf.mxu2 }
 0x195   :  { %v201_v30 = vadd.f32 %v284_v28, %v200_v29 }
 0x197   :  { %v204_v31 = vpack.c.bf16 %v201_v30, %v201_v30 }
 0x199   :  { %205 = vst [vmem:[%s389_s7] sm:$0xf] %v204_v31 }
 0x19c   :  { %v202_v32 = vpop.f32.mrf.mxu2 }

</bundles_post_ra>
